<compile_context>
chip_gen: v7x
topology: tpu7x:2x2x1
jax: 0.10.0
libtpu: 0.0.40
codegen_flags: <defaults>
</compile_context>

<pallas_src>
import functools

import jax
import jax.numpy as jnp
from jax.experimental import pallas as pl
from jax.experimental.pallas import tpu as pltpu

_LANE = 128
_BLOCK_BYTES_TARGET = 2 * 1024 * 1024   # per input, per pipeline buffer
_MAX_BLOCK_ROWS = 8192                  # keeps f32 in-kernel temporaries bounded
_VMEM_LIMIT_BYTES = 32 * 1024 * 1024    # inputs: 2 x 2 x 2 MiB = 8 MiB (+ temps)


def _rmse_log_kernel(fake_ref, real_ref, out_ref, *,
                     block_rows, acc_rows, n_inner, n_full_blocks, rows_valid):
    p = pl.program_id(0)              # parallel chunk (TensorCore-sharding axis)
    k = pl.program_id(1)              # reduction axis ("arbitrary", last)
    block_id = p * n_inner + k        # logical (unclamped) block index

    @pl.when(k == 0)
    def _():
        out_ref[...] = jnp.zeros_like(out_ref)

    eps = jnp.float32(1e-07)

    def _accumulate(f, r):
        d = jnp.log(r) - jnp.log(f)   # |.|^2 == square -> abs unnecessary
        d2 = d * d
        # (block_rows,128) -> (acc_rows,128): purely elementwise vreg adds,
        # acc_rows/8 independent chains (no serial-latency bottleneck, no
        # cross-lane / XLU reduce in the hot loop).
        out_ref[...] += jnp.sum(d2.reshape(-1, acc_rows, _LANE), axis=0)

    @pl.when(block_id < n_full_blocks)
    def _():
        # Fast path (all but at most one block per chunk): no masking work.
        f = fake_ref[...].astype(jnp.float32)
        r = real_ref[...].astype(jnp.float32)
        _accumulate(jnp.where(f == 0, eps, f), jnp.where(r == 0, eps, r))

    @pl.when(block_id >= n_full_blocks)
    def _():
        # Slow path: the partial last block and/or a clamped duplicate block.
        # Out-of-range rows become 1.0 so log(1)-log(1)=0; this also replaces
        # any garbage DMA'd from the padded edge region before the log.
        row = jax.lax.broadcasted_iota(jnp.int32, (block_rows, _LANE), 0)
        in_bounds = block_id * block_rows + row < rows_valid
        f = fake_ref[...].astype(jnp.float32)
        r = real_ref[...].astype(jnp.float32)
        f = jnp.where(in_bounds, jnp.where(f == 0, eps, f), jnp.float32(1.0))
        r = jnp.where(in_bounds, jnp.where(r == 0, eps, r), jnp.float32(1.0))
        _accumulate(f, r)


def _probably_single_tensorcore():
    """Best-effort: True on chips known to expose a single TensorCore."""
    try:
        kind = jax.devices()[0].device_kind.lower()
    except Exception:
        return False
    return any(tag in kind for tag in
               ("v5 lite", "v5e", "v5litepod", "v6 lite", "v6e"))


def rmse_log(fake, real, *, block_rows=None, n_parallel=None):
    """Pallas implementation of RMSE_log.forward for NCHW float inputs."""
    if fake.shape != real.shape:
        # TODO(synk): deprecated F.upsample(mode='bilinear') routes to
        # F.interpolate(align_corners=False); jax.image.resize('bilinear') uses
        # the same half-pixel convention — verify against PyTorch if exercised.
        _, _, H, W = real.shape
        fake = jax.image.resize(
            fake, (fake.shape[0], fake.shape[1], H, W), method="bilinear")

    # Stream the native dtype when both inputs share a supported float dtype
    # (no forced f32 copy of bf16/f16 inputs); otherwise fall back to f32.
    if not (fake.dtype == real.dtype
            and fake.dtype.name in ("float32", "bfloat16", "float16")):
        fake = fake.astype(jnp.float32)
        real = real.astype(jnp.float32)
    itemsize = fake.dtype.itemsize
    sublane = 8 if itemsize == 4 else 16      # (8,128) f32 / (16,128) 16-bit tiling

    n_true = int(real.size)
    f_flat = fake.reshape(-1)
    r_flat = real.reshape(-1)

    # Pad (an HBM copy) only when the element count is not a multiple of one
    # native tile; padding value 1.0 contributes log(1)-log(1)=0.
    tile_elems = sublane * _LANE
    n_padded = pl.cdiv(n_true, tile_elems) * tile_elems
    if n_padded != n_true:
        pad = n_padded - n_true
        f_flat = jnp.pad(f_flat, (0, pad), constant_values=1.0)
        r_flat = jnp.pad(r_flat, (0, pad), constant_values=1.0)

    rows = n_padded // _LANE                  # multiple of `sublane`
    f2d = f_flat.reshape(rows, _LANE)
    r2d = r_flat.reshape(rows, _LANE)

    # Block size: ~2 MiB per input per block (4096 rows f32 / 8192 rows bf16).
    # VMEM footprint: 2 inputs x 2 pipeline buffers x 2 MiB = 8 MiB.
    if block_rows is None:
        block_rows = min(_BLOCK_BYTES_TARGET // (_LANE * itemsize),
                         _MAX_BLOCK_ROWS)
    block_rows = max(sublane, (int(block_rows) // sublane) * sublane)
    block_rows = min(block_rows, rows)

    n_blocks = pl.cdiv(rows, block_rows)
    n_full_blocks = rows // block_rows        # blocks needing no masking

    # 2-way split of the reduction so both TensorCores contribute on v7x
    # (and megacore chips); skipped on known single-TC v5e/v6e so no clamped
    # duplicate block (and its wasted DMA) ever exists there.
    # TODO(synk): on v7x, verify "parallel" shards across both TCs; if not,
    # switch the leading axis to pltpu.CORE_PARALLEL / pl.core_map.
    if n_parallel is None:
        n_parallel = 1 if (_probably_single_tensorcore() or n_blocks < 2) else 2
    n_parallel = max(1, min(int(n_parallel), n_blocks))
    n_inner = pl.cdiv(n_blocks, n_parallel)

    if n_parallel * n_inner == n_blocks:
        def in_map(p, k):
            return (p * n_inner + k, 0)
    else:
        def in_map(p, k):
            # Clamp so the DMA never targets a fully out-of-range block; the
            # duplicate block contributes zero via the masked slow path.
            return (jnp.minimum(p * n_inner + k, n_blocks - 1), 0)

    # Accumulator rows: widest divisor of block_rows up to 64
    # (8 independent (8,128)-vreg add chains at 64).
    acc_rows = 64
    while block_rows % acc_rows != 0:
        acc_rows //= 2

    kernel = functools.partial(
        _rmse_log_kernel,
        block_rows=block_rows, acc_rows=acc_rows, n_inner=n_inner,
        n_full_blocks=n_full_blocks, rows_valid=rows)

    partial = pl.pallas_call(
        kernel,
        out_shape=jax.ShapeDtypeStruct((n_parallel * acc_rows, _LANE),
                                       jnp.float32),
        grid_spec=pltpu.PrefetchScalarGridSpec(
            num_scalar_prefetch=0,
            grid=(n_parallel, n_inner),
            in_specs=[
                # TODO(synk): on v7x, sweep pipeline_mode=pl.Buffered(3) here.
                pl.BlockSpec((block_rows, _LANE), in_map),
                pl.BlockSpec((block_rows, _LANE), in_map),
            ],
            out_specs=pl.BlockSpec((acc_rows, _LANE), lambda p, k: (p, 0)),
        ),
        compiler_params=pltpu.CompilerParams(
            dimension_semantics=("parallel", "arbitrary"),
            vmem_limit_bytes=_VMEM_LIMIT_BYTES),
    )(f2d, r2d)

    # Tiny (<= 128x128) cross-lane reduce + sqrt in the wrapper; the kernel
    # only does lane-dense unmasked stores (no (1,1) masked store, no scratch).
    return jnp.sqrt(jnp.sum(partial) / jnp.float32(n_true))


if __name__ == "__main__":
    key = jax.random.PRNGKey(0)

    def ref_loss(fake, real):
        if fake.shape != real.shape:
            _, _, H, W = real.shape
            fake = jax.image.resize(
                fake, (fake.shape[0], fake.shape[1], H, W), method="bilinear")
        fake = fake.astype(jnp.float32)
        real = real.astype(jnp.float32)
        eps = 1e-07
        r2 = jnp.where(real == 0, eps, real)
        f2 = jnp.where(fake == 0, eps, fake)
        return jnp.sqrt(jnp.mean(jnp.abs(jnp.log(r2) - jnp.log(f2)) ** 2))

    checks = [
        # (fake_shape, real_shape, dtype, kwargs)
        ((2, 4, 16, 16),   (2, 4, 16, 16),   jnp.float32,  {}),   # single-block fast path
        ((2, 3, 15, 17),   (2, 3, 15, 17),   jnp.float32,  {}),   # padded (non-tile-multiple)
        ((4, 8, 128, 128), (4, 8, 128, 128), jnp.float32,  {}),   # 4096-row block, acc_rows=64
        ((2, 4, 44, 64),   (2, 4, 44, 64),   jnp.float32,         # multi-block: partial last
         dict(block_rows=64, n_parallel=2)),                      # block + clamped duplicate
        ((2, 4, 16, 16),   (2, 4, 16, 16),   jnp.bfloat16, {}),   # native bf16 streaming
        ((2, 4, 8, 8),     (2, 4, 16, 16),   jnp.float32,  {}),   # bilinear-resize glue path
    ]
    for idx, (fshape, rshape, dtype, kwargs) in enumerate(checks):
        k1, k2 = jax.random.split(jax.random.fold_in(key, idx))
        # Depth-map-like positive inputs with exact zeros to exercise the
        # `x == 0 -> eps` branch.
        fake = jax.random.uniform(k1, fshape, jnp.float32, 0.0, 5.0).astype(dtype)
        real = jax.random.uniform(k2, rshape, jnp.float32, 0.0, 5.0).astype(dtype)
        fake = fake.at[0, 0, 0, 0].set(0.0)
        real = real.at[1, 2, 3, 4].set(0.0)

        loss = jax.block_until_ready(rmse_log(fake, real, **kwargs))
        ref = ref_loss(fake, real)
        assert jnp.allclose(loss, ref, rtol=1e-4, atol=1e-6), \
            (fshape, rshape, str(dtype), loss, ref)

    print("KERNEL_OK")
</pallas_src>

<mosaic_0001>
module attributes {stable_mosaic.version = 11 : i64} {
  func.func @_rmse_log_kernel(%arg0: i32, %arg1: i32, %arg2: memref<16x128xf32, #tpu.memory_space<vmem>>, %arg3: memref<16x128xf32, #tpu.memory_space<vmem>>, %arg4: memref<16x128xf32, #tpu.memory_space<vmem>>) attributes {dimension_semantics = [#tpu.dimension_semantics<parallel>, #tpu.dimension_semantics<arbitrary>], iteration_bounds = array<i64: 1, 1>, scalar_prefetch = 0 : i64, scratch_operands = 0 : i64, tpu.core_type = #tpu.core_type<tc>, window_params = [{transform_indices = @transform_0, window_bounds = array<i64: 16, 128>}, {transform_indices = @transform_1, window_bounds = array<i64: 16, 128>}, {transform_indices = @transform_2, window_bounds = array<i64: 16, 128>}]} {
    %c1_i32 = arith.constant 1 : i32
    %0 = arith.muli %arg0, %c1_i32 : i32
    %1 = arith.addi %0, %arg1 : i32
    %c0_i32 = arith.constant 0 : i32
    %2 = arith.cmpi eq, %arg1, %c0_i32 : i32
    %3 = arith.extui %2 : i1 to i32
    %c0_i32_0 = arith.constant 0 : i32
    %4 = arith.cmpi ne, %3, %c0_i32_0 : i32
    scf.if %4 {
      %cst_6 = arith.constant 0.000000e+00 : f32
      %11 = vector.broadcast %cst_6 : f32 to vector<16x128xf32>
      %c0 = arith.constant 0 : index
      %c0_7 = arith.constant 0 : index
      %12 = vector.load %arg4[%c0, %c0_7] : memref<16x128xf32, #tpu.memory_space<vmem>>, vector<16x128xf32>
      tpu.vector_store %arg4[%c0, %c0_7], %11 {strides = array<i32>} : memref<16x128xf32, #tpu.memory_space<vmem>>, vector<16x128xf32>,
    } else {
    }
    %c1_i32_1 = arith.constant 1 : i32
    %5 = arith.cmpi slt, %1, %c1_i32_1 : i32
    %6 = arith.extui %5 : i1 to i32
    %cst = arith.constant 1.000000e-07 : f32
    %c0_i32_2 = arith.constant 0 : i32
    %7 = arith.cmpi ne, %6, %c0_i32_2 : i32
    scf.if %7 {
      %c0 = arith.constant 0 : index
      %c0_6 = arith.constant 0 : index
      %11 = vector.load %arg2[%c0, %c0_6] : memref<16x128xf32, #tpu.memory_space<vmem>>, vector<16x128xf32>
      %c0_7 = arith.constant 0 : index
      %c0_8 = arith.constant 0 : index
      %12 = vector.load %arg3[%c0_7, %c0_8] : memref<16x128xf32, #tpu.memory_space<vmem>>, vector<16x128xf32>
      %cst_9 = arith.constant 0.000000e+00 : f32
      %13 = vector.broadcast %cst_9 : f32 to vector<16x128xf32>
      %14 = arith.cmpf oeq, %11, %13 : vector<16x128xf32>
      %15 = vector.broadcast %cst : f32 to vector<16x128xf32>
      %16 = arith.select %14, %15, %11 : vector<16x128xi1>, vector<16x128xf32>
      %cst_10 = arith.constant 0.000000e+00 : f32
      %17 = vector.broadcast %cst_10 : f32 to vector<16x128xf32>
      %18 = arith.cmpf oeq, %12, %17 : vector<16x128xf32>
      %19 = vector.broadcast %cst : f32 to vector<16x128xf32>
      %20 = arith.select %18, %19, %12 : vector<16x128xi1>, vector<16x128xf32>
      %21 = math.log %20 : vector<16x128xf32>
      %22 = math.log %16 : vector<16x128xf32>
      %23 = arith.subf %21, %22 : vector<16x128xf32>
      %24 = arith.mulf %23, %23 : vector<16x128xf32>
      %c0_11 = arith.constant 0 : index
      %c0_12 = arith.constant 0 : index
      %25 = vector.load %arg4[%c0_11, %c0_12] : memref<16x128xf32, #tpu.memory_space<vmem>>, vector<16x128xf32>
      %26 = vector.shape_cast %24 : vector<16x128xf32> to vector<1x16x128xf32>
      %cst_13 = arith.constant dense<0.000000e+00> : vector<16x128xf32>
      %27 = vector.multi_reduction <add>, %26, %cst_13 [0] : vector<1x16x128xf32> to vector<16x128xf32>
      %28 = arith.addf %25, %27 : vector<16x128xf32>
      %c0_14 = arith.constant 0 : index
      %c0_15 = arith.constant 0 : index
      %29 = vector.load %arg4[%c0_14, %c0_15] : memref<16x128xf32, #tpu.memory_space<vmem>>, vector<16x128xf32>
      tpu.vector_store %arg4[%c0_14, %c0_15], %28 {strides = array<i32>} : memref<16x128xf32, #tpu.memory_space<vmem>>, vector<16x128xf32>,
    } else {
    }
    %c1_i32_3 = arith.constant 1 : i32
    %8 = arith.cmpi sge, %1, %c1_i32_3 : i32
    %9 = arith.extui %8 : i1 to i32
    %cst_4 = arith.constant 1.000000e-07 : f32
    %c0_i32_5 = arith.constant 0 : i32
    %10 = arith.cmpi ne, %9, %c0_i32_5 : i32
    scf.if %10 {
      %11 = tpu.iota {dimensions = array<i32: 0>} : vector<16x128xi32>
      %c16_i32 = arith.constant 16 : i32
      %12 = arith.muli %1, %c16_i32 : i32
      %13 = vector.broadcast %12 : i32 to vector<16x128xi32>
      %14 = arith.addi %13, %11 : vector<16x128xi32>
      %c16_i32_6 = arith.constant 16 : i32
      %15 = vector.broadcast %c16_i32_6 : i32 to vector<16x128xi32>
      %16 = arith.cmpi slt, %14, %15 : vector<16x128xi32>
      %c0 = arith.constant 0 : index
      %c0_7 = arith.constant 0 : index
      %17 = vector.load %arg2[%c0, %c0_7] : memref<16x128xf32, #tpu.memory_space<vmem>>, vector<16x128xf32>
      %c0_8 = arith.constant 0 : index
      %c0_9 = arith.constant 0 : index
      %18 = vector.load %arg3[%c0_8, %c0_9] : memref<16x128xf32, #tpu.memory_space<vmem>>, vector<16x128xf32>
      %cst_10 = arith.constant 0.000000e+00 : f32
      %19 = vector.broadcast %cst_10 : f32 to vector<16x128xf32>
      %20 = arith.cmpf oeq, %17, %19 : vector<16x128xf32>
      %21 = vector.broadcast %cst_4 : f32 to vector<16x128xf32>
      %22 = arith.select %20, %21, %17 : vector<16x128xi1>, vector<16x128xf32>
      %cst_11 = arith.constant 1.000000e+00 : f32
      %23 = vector.broadcast %cst_11 : f32 to vector<16x128xf32>
      %24 = arith.select %16, %22, %23 : vector<16x128xi1>, vector<16x128xf32>
      %cst_12 = arith.constant 0.000000e+00 : f32
      %25 = vector.broadcast %cst_12 : f32 to vector<16x128xf32>
      %26 = arith.cmpf oeq, %18, %25 : vector<16x128xf32>
      %27 = vector.broadcast %cst_4 : f32 to vector<16x128xf32>
      %28 = arith.select %26, %27, %18 : vector<16x128xi1>, vector<16x128xf32>
      %cst_13 = arith.constant 1.000000e+00 : f32
      %29 = vector.broadcast %cst_13 : f32 to vector<16x128xf32>
      %30 = arith.select %16, %28, %29 : vector<16x128xi1>, vector<16x128xf32>
      %31 = math.log %30 : vector<16x128xf32>
      %32 = math.log %24 : vector<16x128xf32>
      %33 = arith.subf %31, %32 : vector<16x128xf32>
      %34 = arith.mulf %33, %33 : vector<16x128xf32>
      %c0_14 = arith.constant 0 : index
      %c0_15 = arith.constant 0 : index
      %35 = vector.load %arg4[%c0_14, %c0_15] : memref<16x128xf32, #tpu.memory_space<vmem>>, vector<16x128xf32>
      %36 = vector.shape_cast %34 : vector<16x128xf32> to vector<1x16x128xf32>
      %cst_16 = arith.constant dense<0.000000e+00> : vector<16x128xf32>
      %37 = vector.multi_reduction <add>, %36, %cst_16 [0] : vector<1x16x128xf32> to vector<16x128xf32>
      %38 = arith.addf %35, %37 : vector<16x128xf32>
      %c0_17 = arith.constant 0 : index
      %c0_18 = arith.constant 0 : index
      %39 = vector.load %arg4[%c0_17, %c0_18] : memref<16x128xf32, #tpu.memory_space<vmem>>, vector<16x128xf32>
      tpu.vector_store %arg4[%c0_17, %c0_18], %38 {strides = array<i32>} : memref<16x128xf32, #tpu.memory_space<vmem>>, vector<16x128xf32>,
    } else {
    }
    return
  }
  func.func @transform_0(%arg0: i32, %arg1: i32) -> (i32, i32) {
    %c1_i32 = arith.constant 1 : i32
    %0 = arith.muli %arg0, %c1_i32 : i32
    %1 = arith.addi %0, %arg1 : i32
    %c0_i32 = arith.constant 0 : i32
    %c0_i32_0 = arith.constant 0 : i32
    return %1, %c0_i32 : i32, i32
  }
  func.func @transform_1(%arg0: i32, %arg1: i32) -> (i32, i32) {
    %c1_i32 = arith.constant 1 : i32
    %0 = arith.muli %arg0, %c1_i32 : i32
    %1 = arith.addi %0, %arg1 : i32
    %c0_i32 = arith.constant 0 : i32
    %c0_i32_0 = arith.constant 0 : i32
    return %1, %c0_i32 : i32, i32
  }
  func.func @transform_2(%arg0: i32, %arg1: i32) -> (i32, i32) {
    %c0_i32 = arith.constant 0 : i32
    %c0_i32_0 = arith.constant 0 : i32
    return %arg0, %c0_i32 : i32, i32
  }
}

</mosaic_0001>

<bundles_post_ra>
// kernel: tpu_custom_call.1
= control target key start
LH: loop header
LB: loop body
LE: loop exit
PB: predicated region body
PF: predicated region fallthrough
CT: control target
= control target key end

     0   :  { %7 = vsyncpa [#allocation3], 0  ;;  %s313_s0 = inlined_call_operand.hbm [shape: f32[16,128], index: 0, kind: input, shape index: {}]   ;;  %s314_s1 = inlined_call_operand.hbm [shape: f32[16,128], index: 1, kind: input, shape index: {}]   ;;  %s315_s2 = inlined_call_operand.hbm [shape: f32[16,128], index: 2, kind: output, shape index: {}]  }
   0x1   :  { %8 = vsyncpa [#allocation6], 0 }
   0x2   :  { %9 = vsyncpa [#allocation4], 0  ;;  %s248_s9 = smov [#allocation2]   ;;  %s176_s13 = scalar_lea.hbm %s313_s0, 256 }
   0x3   :  { %s19_s10 = sshll.u32 %s248_s9, 4  ;;  %p177_p0 = scmp.ne.s32.totalorder %s313_s0, %s176_s13  ;;  %s20_s10 = int_to_ptr.vmem [resolvable:$true] %s19_s10 }
   0x4   :  { %p180_p1 = scmp.lt.u32.totalorder %s176_s13, %s313_s0 }
   0x6   :  { %p182_p2 = pnand %p180_p1, %p177_p0 }
   0x8   :  { %185 = shalt.err (!%p182_p2)
}
   0x9   :  { %s186_s18 = scalar_lea.vmem %s20_s10, 256  ;;  %p191_p4 = scmp.lt.s32.totalorder %s20_s10, %s20_s10 }
   0xa   :  { %p187_p3 = scmp.ne.s32.totalorder %s20_s10, %s186_s18  ;;  %p192_p5 = scmp.lt.s32.totalorder %s186_s18, %s186_s18 }
   0xc   :  { %p193_p6 = por %p192_p5, %p191_p4 }
   0xe   :  { %p194_p7 = pnand %p193_p6, %p187_p3 }
  0x10   :  { %197 = shalt.err (!%p194_p7)
}
  0x11   :  { %s249_s19 = smov 128   ;;  %s250_s20 = smov 8  }
  0x12   :  { %25 = dma.hbm_to_vmem [thread:$0]  %s313_s0, 256, %s20_s10, [#allocation3], %s249_s19, %s249_s19, %s250_s20  }
  0x13   :  { %s251_s23 = smov [#allocation5]   ;;  %s198_s27 = scalar_lea.hbm %s314_s1, 256 }
  0x14   :  { %s35_s24 = sshll.u32 %s251_s23, 4  ;;  %p199_p8 = scmp.ne.s32.totalorder %s314_s1, %s198_s27  ;;  %s36_s24 = int_to_ptr.vmem [resolvable:$true] %s35_s24 }
  0x15   :  { %p202_p9 = scmp.lt.u32.totalorder %s198_s27, %s314_s1 }
  0x17   :  { %p204_p10 = pnand %p202_p9, %p199_p8 }
  0x19   :  { %207 = shalt.err (!%p204_p10)
}
  0x1a   :  { %s208_s4 = scalar_lea.vmem %s36_s24, 256  ;;  %p213_p12 = scmp.lt.s32.totalorder %s36_s24, %s36_s24 }
  0x1b   :  { %p209_p11 = scmp.ne.s32.totalorder %s36_s24, %s208_s4  ;;  %p214_p13 = scmp.lt.s32.totalorder %s208_s4, %s208_s4 }
  0x1d   :  { %p215_p0 = por %p214_p13, %p213_p12 }
  0x1f   :  { %p216_p1 = pnand %p215_p0, %p209_p11 }
  0x21   :  { %219 = shalt.err (!%p216_p1)
}
  0x22   :  { %41 = dma.hbm_to_vmem [thread:$0]  %s314_s1, 256, %s36_s24, [#allocation6], %s249_s19, %s249_s19, %s250_s20  }
  0x23   :  { %242 = dma.done.wait [#allocation3], 256  }
  0x24   :  { %243 = vsyncadd [#allocation3], 4294967040 }
  0x25   :  { %244 = dma.done.wait [#allocation6], 256  }
  0x26   :  { %245 = vsyncadd [#allocation6], 4294967040  ;;  %v63_v0 = vld [vmem:[#allocation2] sm:$0xff]  ;;  %v65_v1 = vld [vmem:[#allocation5] sm:$0xff]  ;;  %s252_s1 = smov [#allocation7]  }
  0x27   :  { %v64_v2 = vld [vmem:[#allocation2 + $0x8] sm:$0xff]  ;;  %vm67_vm0 = vcmp.eq.f32.partialorder %v63_v0, 0.0  ;;  %vm71_vm1 = vcmp.eq.f32.partialorder %v65_v1, 0.0  ;;  %v66_v3 = vld [vmem:[#allocation5 + $0x8] sm:$0xff]  ;;  %s149_s6 = sshll.u32 %s252_s1, 4  ;;  %s150_s6 = int_to_ptr.vmem [resolvable:$true] %s149_s6 }
  0x28   :  { %vm68_vm2 = vcmp.eq.f32.partialorder %v64_v2, 0.0  ;;  %v69_v4 = vsel %vm67_vm0, 1e-07, %v63_v0  ;;  %v73_v5 = vsel %vm71_vm1, 1e-07, %v65_v1  ;;  %vm72_vm3 = vcmp.eq.f32.partialorder %v66_v3, 0.0  ;;  %p225_p3 = scmp.lt.s32.totalorder %s150_s6, %s150_s6 }
  0x29   :  { %168 = vlog2.f32 %v73_v5  ;;  %v70_v6 = vsel %vm68_vm2, 1e-07, %v64_v2  ;;  %v74_v7 = vsel %vm72_vm3, 1e-07, %v66_v3  ;;  %s220_s7 = scalar_lea.vmem %s150_s6, 256 }
  0x2a   :  { %170 = vlog2.f32 %v69_v4  ;;  %p221_p2 = scmp.ne.s32.totalorder %s150_s6, %s220_s7  ;;  %p226_p4 = scmp.lt.s32.totalorder %s220_s7, %s220_s7 }
  0x2b   :  { %172 = vlog2.f32 %v74_v7 }
  0x2c   :  { %174 = vlog2.f32 %v70_v6  ;;  %p227_p5 = por %p226_p4, %p225_p3 }
  0x2e   :  { %p228_p6 = pnand %p227_p5, %p221_p2 }
  0x33   :  { %v169_v8 = vpop.eup %168 }
  0x34   :  { %v171_v9 = vpop.eup %170  ;;  %v76_v10 = vmul.f32 0.6931472, %v169_v8 }
  0x35   :  { %v173_v11 = vpop.eup %172  ;;  %v80_v12 = vmul.f32 0.6931472, %v171_v9 }
  0x36   :  { %v175_v13 = vpop.eup %174  ;;  %v78_v14 = vmul.f32 0.6931472, %v173_v11 }
  0x37   :  { %v83_v15 = vsub.f32 %v76_v10, %v80_v12  ;;  %v82_v16 = vmul.f32 0.6931472, %v175_v13 }
  0x39   :  { %v85_v17 = vmul.f32 %v83_v15, %v83_v15  ;;  %v84_v18 = vsub.f32 %v78_v14, %v82_v16 }
  0x3b   :  { %v86_v19 = vmul.f32 %v84_v18, %v84_v18  ;;  %93 = vst [vmem:[#allocation7] sm:$0xff] %v85_v17 }
  0x3d   :  { %94 = vst [vmem:[#allocation7 + $0x8] sm:$0xff] %v86_v19 }
  0x3e   :  { %231 = shalt.err (!%p228_p6)
}
  0x3f   :  { %s232_s10 = scalar_lea.hbm %s315_s2, 256 }
  0x40   :  { %p233_p7 = scmp.ne.s32.totalorder %s315_s2, %s232_s10  ;;  %p236_p8 = scmp.lt.u32.totalorder %s232_s10, %s315_s2 }
  0x42   :  { %p238_p9 = pnand %p236_p8, %p233_p7 }
  0x44   :  { %241 = shalt.err (!%p238_p9)
}
  0x45   :  { %155 = dma.vmem_to_hbm [thread:$0]  %s150_s6, 256, %s315_s2, [#allocation4], %s249_s19, %s249_s19, %s250_s20  }
  0x46   :  { %246 = dma.done.wait [#allocation4], 256  }
  0x47   :  { %247 = vsyncadd [#allocation4], 4294967040 }
  0x48   :  { %159 = vsyncpa [#allocation3], 1 }
  0x49   :  { %160 = vsyncpa [#allocation6], 1 }
  0x4a   :  { %161 = vsyncpa [#allocation4], 1 }

</bundles_post_ra>
